<compile_context>
chip_gen: v7x
topology: tpu7x:2x2x1
jax: 0.10.0
libtpu: 0.0.40
codegen_flags: <defaults>
</compile_context>

<pallas_src>
import math
import functools

import jax
import jax.numpy as jnp
from jax import lax
from jax.experimental import pallas as pl
from jax.experimental.pallas import tpu as pltpu


def _attn_kernel(scalars_ref,          # SMEM (2,)  [n_bias, n_clip]
                 hq_ref,               # VMEM (1, tq, HID)   query rows
                 hkv_ref,              # VMEM (1, S,  HID)   key/value rows
                 wq_ref, bq_ref,       # VMEM (1, HID, BD), (1, 1, BD)   (pre-scaled)
                 wkv_ref, bkv_ref,     # VMEM (1, HID, 2BD), (1, 1, 2BD)
                 mask_ref,             # VMEM (1, 1, 1, S)   additive mask
                 o_ref,                # VMEM (1, tq, BD)    slab of (B, S, HID)
                 k_scr, v_scr,         # VMEM (S, BD) scratch, persist over q-tiles
                 *, hb, d):
    n_bias = scalars_ref[0]
    n_clip = scalars_ref[1]
    bd = hb * d

    # K/V projection for the full sequence, once per (batch, head-block).
    # Fused [Wk | Wv] matmul -> N = 2*BD wide on the MXU.
    @pl.when(pl.program_id(2) == 0)
    def _():
        kv = jnp.dot(hkv_ref[0], wkv_ref[0],
                     preferred_element_type=jnp.float32) + bkv_ref[0, 0]  # (S, 2BD)
        k_scr[...] = kv[:, :bd].astype(k_scr.dtype)
        v_scr[...] = kv[:, bd:].astype(v_scr.dtype)

    # Q projection for this query tile (1/sqrt(D) already folded into Wq/bq).
    q = jnp.dot(hq_ref[0], wq_ref[0],
                preferred_element_type=jnp.float32) + bq_ref[0, 0]        # (tq, BD)
    q = q.astype(k_scr.dtype)

    k = k_scr[...]                       # (S, BD)
    v = v_scr[...]                       # (S, BD)
    mask = mask_ref[0, 0]                # (1, S) -> broadcasts over query rows

    ctx_parts = []
    for i in range(hb):                  # static unroll over heads in the block
        sl = slice(i * d, (i + 1) * d)
        q_i, k_i, v_i = q[:, sl], k[:, sl], v[:, sl]

        # scores_i = q_i @ k_i.T  (contract head_dim of both operands)
        s_i = lax.dot_general(q_i, k_i, (((1,), (1,)), ((), ())),
                              preferred_element_type=jnp.float32)          # (tq, S)
        s_i = s_i + mask

        # softermax: exp(x - m) / (n_bias * exp(-m) + sum(exp(x - m)))
        m_i = jnp.max(s_i, axis=-1, keepdims=True)
        e_i = jnp.exp(s_i - m_i)
        denom = n_bias * jnp.exp(-m_i) + jnp.sum(e_i, axis=-1, keepdims=True)
        p_i = e_i * pl.reciprocal(denom, approx=True)      # EUP slot, ~free

        # clip_logits: zero out probabilities below n_clip (no renorm).
        p_i = jnp.where(p_i < n_clip, 0.0, p_i)

        ctx_parts.append(jnp.dot(p_i.astype(v_i.dtype), v_i,
                                 preferred_element_type=jnp.float32))      # (tq, D)

    ctx = ctx_parts[0] if hb == 1 else jnp.concatenate(ctx_parts, axis=-1)  # (tq, BD)
    o_ref[0] = ctx.astype(o_ref.dtype)


def _pick_head_block(num_heads, head_dim):
    # Prefer Hb*D == 128 (lane-dense output stores, saturates the v5e MXU and,
    # with the fused K/V matmul, gives N=256 for v6e/v7x), then 256, otherwise
    # fall back to all heads in one block (small / odd configs).
    for target in (128, 256):
        if target % head_dim == 0:
            hb = target // head_dim
            if 1 <= hb <= num_heads and num_heads % hb == 0:
                return hb
    return num_heads


def _pick_q_tile(seq_len):
    # Bound the (tq, S) scores/probs working set for long sequences.
    if seq_len <= 256:
        return seq_len
    for tq in (256, 128, 64, 32, 16, 8):
        if seq_len % tq == 0:
            return tq
    return seq_len


def softerbert_self_attention(hidden_states, wq, bq, wk, bk, wv, bv,
                              attention_mask, n_bias, n_clip, num_heads,
                              *, head_block=None, q_tile=None,
                              use_bf16_matmul=False,
                              vmem_limit_bytes=48 * 1024 * 1024):
    """hidden_states: (B, S, HID); w*: (HID, HID) pre-transposed (x @ W + b);
    b*: (HID,); attention_mask: (B, 1, 1, S) additive.  Returns (B, S, HID)."""
    B, S, HID = hidden_states.shape
    H = num_heads
    D = HID // H

    hb = head_block if head_block is not None else _pick_head_block(H, D)
    assert H % hb == 0
    n_hb = H // hb
    BD = hb * D

    tq = q_tile if q_tile is not None else _pick_q_tile(S)
    assert S % tq == 0
    n_tq = S // tq

    compute_dtype = jnp.bfloat16 if use_bf16_matmul else hidden_states.dtype
    scale = 1.0 / math.sqrt(D)

    def to_blocks(w):                    # (HID, H*D) -> (n_hb, HID, BD)
        return jnp.transpose(w.reshape(HID, n_hb, BD), (1, 0, 2))

    # Fold the 1/sqrt(D) score scaling into the Q projection (free).
    wq_b = to_blocks(wq * scale).astype(compute_dtype)
    bq_b = (bq * scale).reshape(n_hb, 1, BD).astype(jnp.float32)
    # Fuse K and V projections into one wide operand [Wk | Wv].
    wkv_b = jnp.concatenate([to_blocks(wk), to_blocks(wv)],
                            axis=-1).astype(compute_dtype)
    bkv_b = jnp.concatenate([bk.reshape(n_hb, 1, BD),
                             bv.reshape(n_hb, 1, BD)],
                            axis=-1).astype(jnp.float32)

    h = hidden_states.astype(compute_dtype)
    mask = attention_mask.astype(jnp.float32)
    scalars = jnp.array([n_bias, n_clip], dtype=jnp.float32)

    kernel = functools.partial(_attn_kernel, hb=hb, d=D)

    out = pl.pallas_call(
        kernel,
        out_shape=jax.ShapeDtypeStruct((B, S, HID), hidden_states.dtype),
        grid=(B, n_hb, n_tq),
        in_specs=[
            pl.BlockSpec(memory_space=pltpu.MemorySpace.SMEM),              # scalars
            pl.BlockSpec((1, tq, HID), lambda b, g, qi: (b, qi, 0)),        # hidden (Q rows)
            pl.BlockSpec((1, S, HID),  lambda b, g, qi: (b, 0, 0)),         # hidden (K/V rows)
            pl.BlockSpec((1, HID, BD), lambda b, g, qi: (g, 0, 0)),         # Wq block
            pl.BlockSpec((1, 1, BD),   lambda b, g, qi: (g, 0, 0)),         # bq block
            pl.BlockSpec((1, HID, 2 * BD), lambda b, g, qi: (g, 0, 0)),     # W[k|v] block
            pl.BlockSpec((1, 1, 2 * BD),   lambda b, g, qi: (g, 0, 0)),     # b[k|v] block
            pl.BlockSpec((1, 1, 1, S), lambda b, g, qi: (b, 0, 0, 0)),      # mask
        ],
        # Lane-dense (B, S, HID) output written directly -> no wrapper transpose.
        out_specs=pl.BlockSpec((1, tq, BD), lambda b, g, qi: (b, qi, g)),
        scratch_shapes=[pltpu.VMEM((S, BD), compute_dtype),   # K, resident over q-tiles
                        pltpu.VMEM((S, BD), compute_dtype)],  # V
        compiler_params=pltpu.CompilerParams(
            dimension_semantics=("parallel", "parallel", "arbitrary"),
            vmem_limit_bytes=vmem_limit_bytes),
    )(scalars, h, h, wq_b, bq_b, wkv_b, bkv_b, mask)

    return out    # == context_layer, shape (B, S, HID)


def reference(hidden_states, wq, bq, wk, bk, wv, bv, attention_mask,
              n_bias, n_clip, num_heads):
    B, S, HID = hidden_states.shape
    D = HID // num_heads

    def split(x):  # (B,S,HID) -> (B,H,S,D)
        return jnp.transpose(x.reshape(B, S, num_heads, D), (0, 2, 1, 3))

    q = split(hidden_states @ wq + bq)
    k = split(hidden_states @ wk + bk)
    v = split(hidden_states @ wv + bv)
    scores = jnp.einsum("bhqd,bhkd->bhqk", q, k) / math.sqrt(D)
    scores = scores + attention_mask
    m = jnp.max(scores, axis=-1, keepdims=True)
    e = jnp.exp(scores - m)
    denom = n_bias * jnp.exp(-m) + jnp.sum(e, axis=-1, keepdims=True)
    probs = e / denom
    probs = jnp.where(probs < n_clip, 0.0, probs)
    ctx = jnp.einsum("bhqk,bhkd->bhqd", probs, v)
    return jnp.transpose(ctx, (0, 2, 1, 3)).reshape(B, S, HID)


if __name__ == "__main__":
    B, S, HID, H = 2, 8, 32, 4
    n_bias, n_clip = 1.0, 0.01

    key = jax.random.PRNGKey(0)
    ks = jax.random.split(key, 8)
    hidden_states = jax.random.normal(ks[0], (B, S, HID), dtype=jnp.float32)
    # nn.Linear weights, stored pre-transposed as (in, out).
    wq = jax.random.normal(ks[1], (HID, HID), dtype=jnp.float32) * 0.05
    wk = jax.random.normal(ks[2], (HID, HID), dtype=jnp.float32) * 0.05
    wv = jax.random.normal(ks[3], (HID, HID), dtype=jnp.float32) * 0.05
    bq = jax.random.normal(ks[4], (HID,), dtype=jnp.float32) * 0.01
    bk = jax.random.normal(ks[5], (HID,), dtype=jnp.float32) * 0.01
    bv = jax.random.normal(ks[6], (HID,), dtype=jnp.float32) * 0.01
    # Additive attention mask (0 = keep, -1e9 = masked); mask last pos of batch 1.
    attention_mask = jnp.zeros((B, 1, 1, S), dtype=jnp.float32)
    attention_mask = attention_mask.at[1, 0, 0, S - 1].set(-1e9)

    ref = reference(hidden_states, wq, bq, wk, bk, wv, bv, attention_mask,
                    n_bias, n_clip, H)

    # f32 path (matches module numerics; approx reciprocal => slightly loosened tol).
    fn = jax.jit(functools.partial(softerbert_self_attention, num_heads=H))
    out = jax.block_until_ready(
        fn(hidden_states, wq, bq, wk, bk, wv, bv, attention_mask, n_bias, n_clip))
    assert out.shape == (B, S, HID)
    assert jnp.allclose(out, ref, rtol=5e-3, atol=5e-3), "f32 kernel mismatch vs reference"

    # bf16 MXU-operand path (recommended on v6e/v7x); softmax stays f32.
    fn_bf16 = jax.jit(functools.partial(softerbert_self_attention, num_heads=H,
                                        use_bf16_matmul=True))
    out_bf16 = jax.block_until_ready(
        fn_bf16(hidden_states, wq, bq, wk, bk, wv, bv, attention_mask,
                n_bias, n_clip))
    assert jnp.allclose(out_bf16, ref, rtol=5e-2, atol=5e-2), "bf16 kernel mismatch vs reference"

    print("KERNEL_OK")
</pallas_src>

<mosaic_0001>
module attributes {stable_mosaic.version = 11 : i64} {
  func.func @_attn_kernel(%arg0: i32, %arg1: i32, %arg2: i32, %arg3: memref<2xf32, #tpu.memory_space<smem>>, %arg4: memref<1x8x32xf32, #tpu.memory_space<vmem>>, %arg5: memref<1x8x32xf32, #tpu.memory_space<vmem>>, %arg6: memref<1x32x32xf32, #tpu.memory_space<vmem>>, %arg7: memref<1x1x32xf32, #tpu.memory_space<vmem>>, %arg8: memref<1x32x64xf32, #tpu.memory_space<vmem>>, %arg9: memref<1x1x64xf32, #tpu.memory_space<vmem>>, %arg10: memref<1x1x1x8xf32, #tpu.memory_space<vmem>>, %arg11: memref<1x8x32xf32, #tpu.memory_space<vmem>>, %arg12: memref<8x32xf32, #tpu.memory_space<vmem>>, %arg13: memref<8x32xf32, #tpu.memory_space<vmem>>) attributes {dimension_semantics = [#tpu.dimension_semantics<parallel>, #tpu.dimension_semantics<parallel>, #tpu.dimension_semantics<arbitrary>], iteration_bounds = array<i64: 2, 1, 1>, scalar_prefetch = 0 : i64, scratch_operands = 2 : i64, tpu.core_type = #tpu.core_type<tc>, window_params = [{transform_indices = @transform_0, window_bounds = array<i64: 2>}, {transform_indices = @transform_1, window_bounds = array<i64: 1, 8, 32>}, {transform_indices = @transform_2, window_bounds = array<i64: 1, 8, 32>}, {transform_indices = @transform_3, window_bounds = array<i64: 1, 32, 32>}, {transform_indices = @transform_4, window_bounds = array<i64: 1, 1, 32>}, {transform_indices = @transform_5, window_bounds = array<i64: 1, 32, 64>}, {transform_indices = @transform_6, window_bounds = array<i64: 1, 1, 64>}, {transform_indices = @transform_7, window_bounds = array<i64: 1, 1, 1, 8>}, {transform_indices = @transform_8, window_bounds = array<i64: 1, 8, 32>}]} {
    %c0 = arith.constant 0 : index
    %0 = memref.load %arg3[%c0] : memref<2xf32, #tpu.memory_space<smem>>
    %c1 = arith.constant 1 : index
    %1 = memref.load %arg3[%c1] : memref<2xf32, #tpu.memory_space<smem>>
    %c0_i32 = arith.constant 0 : i32
    %2 = arith.cmpi eq, %arg2, %c0_i32 : i32
    %3 = arith.extui %2 : i1 to i32
    %c0_i32_0 = arith.constant 0 : i32
    %4 = arith.cmpi ne, %3, %c0_i32_0 : i32
    scf.if %4 {
      %c0_45 = arith.constant 0 : index
      %c0_46 = arith.constant 0 : index
      %c0_47 = arith.constant 0 : index
      %131 = vector.load %arg5[%c0_45, %c0_46, %c0_47] : memref<1x8x32xf32, #tpu.memory_space<vmem>>, vector<1x8x32xf32>
      %132 = vector.shape_cast %131 : vector<1x8x32xf32> to vector<8x32xf32>
      %c0_48 = arith.constant 0 : index
      %c0_49 = arith.constant 0 : index
      %c0_50 = arith.constant 0 : index
      %133 = vector.load %arg8[%c0_48, %c0_49, %c0_50] : memref<1x32x64xf32, #tpu.memory_space<vmem>>, vector<1x32x64xf32>
      %134 = vector.shape_cast %133 : vector<1x32x64xf32> to vector<32x64xf32>
      %cst_51 = arith.constant dense<0.000000e+00> : vector<8x64xf32>
      %135 = tpu.matmul %132, %134, %cst_51 {dimension_numbers = #tpu.dot_dimension_numbers<[1], [0], [0], [1], [0, 0, 1, 1], [], []>} : vector<8x32xf32>, vector<32x64xf32>, vector<8x64xf32> -> vector<8x64xf32>
      %c0_52 = arith.constant 0 : index
      %c0_53 = arith.constant 0 : index
      %c0_54 = arith.constant 0 : index
      %136 = vector.load %arg9[%c0_52, %c0_53, %c0_54] : memref<1x1x64xf32, #tpu.memory_space<vmem>>, vector<1x1x64xf32>
      %137 = vector.shape_cast %136 : vector<1x1x64xf32> to vector<64xf32>
      %138 = vector.shape_cast %137 : vector<64xf32> to vector<1x64xf32>
      %139 = vector.broadcast %138 : vector<1x64xf32> to vector<8x64xf32>
      %140 = arith.addf %135, %139 : vector<8x64xf32>
      %141 = vector.extract_strided_slice %140 {offsets = [0, 0], sizes = [8, 32], strides = [1, 1]} : vector<8x64xf32> to vector<8x32xf32>
      %c0_55 = arith.constant 0 : index
      %c0_56 = arith.constant 0 : index
      %142 = vector.load %arg12[%c0_55, %c0_56] : memref<8x32xf32, #tpu.memory_space<vmem>>, vector<8x32xf32>
      tpu.vector_store %arg12[%c0_55, %c0_56], %141 {strides = array<i32>} : memref<8x32xf32, #tpu.memory_space<vmem>>, vector<8x32xf32>,
      %143 = vector.extract_strided_slice %140 {offsets = [0, 32], sizes = [8, 32], strides = [1, 1]} : vector<8x64xf32> to vector<8x32xf32>
      %c0_57 = arith.constant 0 : index
      %c0_58 = arith.constant 0 : index
      %144 = vector.load %arg13[%c0_57, %c0_58] : memref<8x32xf32, #tpu.memory_space<vmem>>, vector<8x32xf32>
      tpu.vector_store %arg13[%c0_57, %c0_58], %143 {strides = array<i32>} : memref<8x32xf32, #tpu.memory_space<vmem>>, vector<8x32xf32>,
    } else {
    }
    %c0_1 = arith.constant 0 : index
    %c0_2 = arith.constant 0 : index
    %c0_3 = arith.constant 0 : index
    %5 = vector.load %arg4[%c0_1, %c0_2, %c0_3] : memref<1x8x32xf32, #tpu.memory_space<vmem>>, vector<1x8x32xf32>
    %6 = vector.shape_cast %5 : vector<1x8x32xf32> to vector<8x32xf32>
    %c0_4 = arith.constant 0 : index
    %c0_5 = arith.constant 0 : index
    %c0_6 = arith.constant 0 : index
    %7 = vector.load %arg6[%c0_4, %c0_5, %c0_6] : memref<1x32x32xf32, #tpu.memory_space<vmem>>, vector<1x32x32xf32>
    %8 = vector.shape_cast %7 : vector<1x32x32xf32> to vector<32x32xf32>
    %cst = arith.constant dense<0.000000e+00> : vector<8x32xf32>
    %9 = tpu.matmul %6, %8, %cst {dimension_numbers = #tpu.dot_dimension_numbers<[1], [0], [0], [1], [0, 0, 1, 1], [], []>} : vector<8x32xf32>, vector<32x32xf32>, vector<8x32xf32> -> vector<8x32xf32>
    %c0_7 = arith.constant 0 : index
    %c0_8 = arith.constant 0 : index
    %c0_9 = arith.constant 0 : index
    %10 = vector.load %arg7[%c0_7, %c0_8, %c0_9] : memref<1x1x32xf32, #tpu.memory_space<vmem>>, vector<1x1x32xf32>
    %11 = vector.shape_cast %10 : vector<1x1x32xf32> to vector<32xf32>
    %12 = vector.shape_cast %11 : vector<32xf32> to vector<1x32xf32>
    %13 = vector.broadcast %12 : vector<1x32xf32> to vector<8x32xf32>
    %14 = arith.addf %9, %13 : vector<8x32xf32>
    %c0_10 = arith.constant 0 : index
    %c0_11 = arith.constant 0 : index
    %15 = vector.load %arg12[%c0_10, %c0_11] : memref<8x32xf32, #tpu.memory_space<vmem>>, vector<8x32xf32>
    %c0_12 = arith.constant 0 : index
    %c0_13 = arith.constant 0 : index
    %16 = vector.load %arg13[%c0_12, %c0_13] : memref<8x32xf32, #tpu.memory_space<vmem>>, vector<8x32xf32>
    %c0_14 = arith.constant 0 : index
    %c0_15 = arith.constant 0 : index
    %c0_16 = arith.constant 0 : index
    %c0_17 = arith.constant 0 : index
    %17 = vector.load %arg10[%c0_14, %c0_15, %c0_16, %c0_17] : memref<1x1x1x8xf32, #tpu.memory_space<vmem>>, vector<1x1x1x8xf32>
    %18 = vector.shape_cast %17 : vector<1x1x1x8xf32> to vector<1x8xf32>
    %19 = vector.extract_strided_slice %14 {offsets = [0, 0], sizes = [8, 8], strides = [1, 1]} : vector<8x32xf32> to vector<8x8xf32>
    %20 = vector.extract_strided_slice %15 {offsets = [0, 0], sizes = [8, 8], strides = [1, 1]} : vector<8x32xf32> to vector<8x8xf32>
    %21 = vector.extract_strided_slice %16 {offsets = [0, 0], sizes = [8, 8], strides = [1, 1]} : vector<8x32xf32> to vector<8x8xf32>
    %cst_18 = arith.constant dense<0.000000e+00> : vector<8x8xf32>
    %22 = tpu.matmul %19, %20, %cst_18 {dimension_numbers = #tpu.dot_dimension_numbers<[1], [1], [0], [0], [0, 0, 1, 0], [], []>} : vector<8x8xf32>, vector<8x8xf32>, vector<8x8xf32> -> vector<8x8xf32>
    %23 = vector.broadcast %18 : vector<1x8xf32> to vector<8x8xf32>
    %24 = arith.addf %22, %23 : vector<8x8xf32>
    %cst_19 = arith.constant dense<0xFF800000> : vector<8xf32>
    %25 = vector.multi_reduction <maximumf>, %24, %cst_19 [1] : vector<8x8xf32> to vector<8xf32>
    %26 = vector.shape_cast %25 : vector<8xf32> to vector<8x1xf32>
    %27 = vector.broadcast %26 : vector<8x1xf32> to vector<8x8xf32>
    %28 = arith.subf %24, %27 : vector<8x8xf32>
    %29 = math.exp %28 : vector<8x8xf32>
    %cst_20 = arith.constant 0.000000e+00 : f32
    %30 = vector.broadcast %cst_20 : f32 to vector<8x1xf32>
    %31 = arith.subf %30, %26 : vector<8x1xf32>
    %32 = math.exp %31 : vector<8x1xf32>
    %33 = vector.broadcast %0 : f32 to vector<8x1xf32>
    %34 = arith.mulf %33, %32 : vector<8x1xf32>
    %cst_21 = arith.constant dense<0.000000e+00> : vector<8xf32>
    %35 = vector.multi_reduction <add>, %29, %cst_21 [1] : vector<8x8xf32> to vector<8xf32>
    %36 = vector.shape_cast %35 : vector<8xf32> to vector<8x1xf32>
    %37 = arith.addf %34, %36 : vector<8x1xf32>
    %38 = tpu.reciprocal %37 {approx = true} : vector<8x1xf32> -> vector<8x1xf32>
    %39 = vector.broadcast %38 : vector<8x1xf32> to vector<8x8xf32>
    %40 = arith.mulf %29, %39 : vector<8x8xf32>
    %41 = vector.broadcast %1 : f32 to vector<8x8xf32>
    %42 = arith.cmpf olt, %40, %41 : vector<8x8xf32>
    %cst_22 = arith.constant 0.000000e+00 : f32
    %43 = vector.broadcast %cst_22 : f32 to vector<8x8xf32>
    %44 = arith.select %42, %43, %40 : vector<8x8xi1>, vector<8x8xf32>
    %cst_23 = arith.constant dense<0.000000e+00> : vector<8x8xf32>
    %45 = tpu.matmul %44, %21, %cst_23 {dimension_numbers = #tpu.dot_dimension_numbers<[1], [0], [0], [1], [0, 0, 1, 1], [], []>} : vector<8x8xf32>, vector<8x8xf32>, vector<8x8xf32> -> vector<8x8xf32>
    %46 = vector.extract_strided_slice %14 {offsets = [0, 8], sizes = [8, 8], strides = [1, 1]} : vector<8x32xf32> to vector<8x8xf32>
    %47 = vector.extract_strided_slice %15 {offsets = [0, 8], sizes = [8, 8], strides = [1, 1]} : vector<8x32xf32> to vector<8x8xf32>
    %48 = vector.extract_strided_slice %16 {offsets = [0, 8], sizes = [8, 8], strides = [1, 1]} : vector<8x32xf32> to vector<8x8xf32>
    %cst_24 = arith.constant dense<0.000000e+00> : vector<8x8xf32>
    %49 = tpu.matmul %46, %47, %cst_24 {dimension_numbers = #tpu.dot_dimension_numbers<[1], [1], [0], [0], [0, 0, 1, 0], [], []>} : vector<8x8xf32>, vector<8x8xf32>, vector<8x8xf32> -> vector<8x8xf32>
    %50 = vector.broadcast %18 : vector<1x8xf32> to vector<8x8xf32>
    %51 = arith.addf %49, %50 : vector<8x8xf32>
    %cst_25 = arith.constant dense<0xFF800000> : vector<8xf32>
    %52 = vector.multi_reduction <maximumf>, %51, %cst_25 [1] : vector<8x8xf32> to vector<8xf32>
    %53 = vector.shape_cast %52 : vector<8xf32> to vector<8x1xf32>
    %54 = vector.broadcast %53 : vector<8x1xf32> to vector<8x8xf32>
    %55 = arith.subf %51, %54 : vector<8x8xf32>
    %56 = math.exp %55 : vector<8x8xf32>
    %cst_26 = arith.constant 0.000000e+00 : f32
    %57 = vector.broadcast %cst_26 : f32 to vector<8x1xf32>
    %58 = arith.subf %57, %53 : vector<8x1xf32>
    %59 = math.exp %58 : vector<8x1xf32>
    %60 = vector.broadcast %0 : f32 to vector<8x1xf32>
    %61 = arith.mulf %60, %59 : vector<8x1xf32>
    %cst_27 = arith.constant dense<0.000000e+00> : vector<8xf32>
    %62 = vector.multi_reduction <add>, %56, %cst_27 [1] : vector<8x8xf32> to vector<8xf32>
    %63 = vector.shape_cast %62 : vector<8xf32> to vector<8x1xf32>
    %64 = arith.addf %61, %63 : vector<8x1xf32>
    %65 = tpu.reciprocal %64 {approx = true} : vector<8x1xf32> -> vector<8x1xf32>
    %66 = vector.broadcast %65 : vector<8x1xf32> to vector<8x8xf32>
    %67 = arith.mulf %56, %66 : vector<8x8xf32>
    %68 = vector.broadcast %1 : f32 to vector<8x8xf32>
    %69 = arith.cmpf olt, %67, %68 : vector<8x8xf32>
    %cst_28 = arith.constant 0.000000e+00 : f32
    %70 = vector.broadcast %cst_28 : f32 to vector<8x8xf32>
    %71 = arith.select %69, %70, %67 : vector<8x8xi1>, vector<8x8xf32>
    %cst_29 = arith.constant dense<0.000000e+00> : vector<8x8xf32>
    %72 = tpu.matmul %71, %48, %cst_29 {dimension_numbers = #tpu.dot_dimension_numbers<[1], [0], [0], [1], [0, 0, 1, 1], [], []>} : vector<8x8xf32>, vector<8x8xf32>, vector<8x8xf32> -> vector<8x8xf32>
    %73 = vector.extract_strided_slice %14 {offsets = [0, 16], sizes = [8, 8], strides = [1, 1]} : vector<8x32xf32> to vector<8x8xf32>
    %74 = vector.extract_strided_slice %15 {offsets = [0, 16], sizes = [8, 8], strides = [1, 1]} : vector<8x32xf32> to vector<8x8xf32>
    %75 = vector.extract_strided_slice %16 {offsets = [0, 16], sizes = [8, 8], strides = [1, 1]} : vector<8x32xf32> to vector<8x8xf32>
    %cst_30 = arith.constant dense<0.000000e+00> : vector<8x8xf32>
    %76 = tpu.matmul %73, %74, %cst_30 {dimension_numbers = #tpu.dot_dimension_numbers<[1], [1], [0], [0], [0, 0, 1, 0], [], []>} : vector<8x8xf32>, vector<8x8xf32>, vector<8x8xf32> -> vector<8x8xf32>
    %77 = vector.broadcast %18 : vector<1x8xf32> to vector<8x8xf32>
    %78 = arith.addf %76, %77 : vector<8x8xf32>
    %cst_31 = arith.constant dense<0xFF800000> : vector<8xf32>
    %79 = vector.multi_reduction <maximumf>, %78, %cst_31 [1] : vector<8x8xf32> to vector<8xf32>
    %80 = vector.shape_cast %79 : vector<8xf32> to vector<8x1xf32>
    %81 = vector.broadcast %80 : vector<8x1xf32> to vector<8x8xf32>
    %82 = arith.subf %78, %81 : vector<8x8xf32>
    %83 = math.exp %82 : vector<8x8xf32>
    %cst_32 = arith.constant 0.000000e+00 : f32
    %84 = vector.broadcast %cst_32 : f32 to vector<8x1xf32>
    %85 = arith.subf %84, %80 : vector<8x1xf32>
    %86 = math.exp %85 : vector<8x1xf32>
    %87 = vector.broadcast %0 : f32 to vector<8x1xf32>
    %88 = arith.mulf %87, %86 : vector<8x1xf32>
    %cst_33 = arith.constant dense<0.000000e+00> : vector<8xf32>
    %89 = vector.multi_reduction <add>, %83, %cst_33 [1] : vector<8x8xf32> to vector<8xf32>
    %90 = vector.shape_cast %89 : vector<8xf32> to vector<8x1xf32>
    %91 = arith.addf %88, %90 : vector<8x1xf32>
    %92 = tpu.reciprocal %91 {approx = true} : vector<8x1xf32> -> vector<8x1xf32>
    %93 = vector.broadcast %92 : vector<8x1xf32> to vector<8x8xf32>
    %94 = arith.mulf %83, %93 : vector<8x8xf32>
    %95 = vector.broadcast %1 : f32 to vector<8x8xf32>
    %96 = arith.cmpf olt, %94, %95 : vector<8x8xf32>
    %cst_34 = arith.constant 0.000000e+00 : f32
    %97 = vector.broadcast %cst_34 : f32 to vector<8x8xf32>
    %98 = arith.select %96, %97, %94 : vector<8x8xi1>, vector<8x8xf32>
    %cst_35 = arith.constant dense<0.000000e+00> : vector<8x8xf32>
    %99 = tpu.matmul %98, %75, %cst_35 {dimension_numbers = #tpu.dot_dimension_numbers<[1], [0], [0], [1], [0, 0, 1, 1], [], []>} : vector<8x8xf32>, vector<8x8xf32>, vector<8x8xf32> -> vector<8x8xf32>
    %100 = vector.extract_strided_slice %14 {offsets = [0, 24], sizes = [8, 8], strides = [1, 1]} : vector<8x32xf32> to vector<8x8xf32>
    %101 = vector.extract_strided_slice %15 {offsets = [0, 24], sizes = [8, 8], strides = [1, 1]} : vector<8x32xf32> to vector<8x8xf32>
    %102 = vector.extract_strided_slice %16 {offsets = [0, 24], sizes = [8, 8], strides = [1, 1]} : vector<8x32xf32> to vector<8x8xf32>
    %cst_36 = arith.constant dense<0.000000e+00> : vector<8x8xf32>
    %103 = tpu.matmul %100, %101, %cst_36 {dimension_numbers = #tpu.dot_dimension_numbers<[1], [1], [0], [0], [0, 0, 1, 0], [], []>} : vector<8x8xf32>, vector<8x8xf32>, vector<8x8xf32> -> vector<8x8xf32>
    %104 = vector.broadcast %18 : vector<1x8xf32> to vector<8x8xf32>
    %105 = arith.addf %103, %104 : vector<8x8xf32>
    %cst_37 = arith.constant dense<0xFF800000> : vector<8xf32>
    %106 = vector.multi_reduction <maximumf>, %105, %cst_37 [1] : vector<8x8xf32> to vector<8xf32>
    %107 = vector.shape_cast %106 : vector<8xf32> to vector<8x1xf32>
    %108 = vector.broadcast %107 : vector<8x1xf32> to vector<8x8xf32>
    %109 = arith.subf %105, %108 : vector<8x8xf32>
    %110 = math.exp %109 : vector<8x8xf32>
    %cst_38 = arith.constant 0.000000e+00 : f32
    %111 = vector.broadcast %cst_38 : f32 to vector<8x1xf32>
    %112 = arith.subf %111, %107 : vector<8x1xf32>
    %113 = math.exp %112 : vector<8x1xf32>
    %114 = vector.broadcast %0 : f32 to vector<8x1xf32>
    %115 = arith.mulf %114, %113 : vector<8x1xf32>
    %cst_39 = arith.constant dense<0.000000e+00> : vector<8xf32>
    %116 = vector.multi_reduction <add>, %110, %cst_39 [1] : vector<8x8xf32> to vector<8xf32>
    %117 = vector.shape_cast %116 : vector<8xf32> to vector<8x1xf32>
    %118 = arith.addf %115, %117 : vector<8x1xf32>
    %119 = tpu.reciprocal %118 {approx = true} : vector<8x1xf32> -> vector<8x1xf32>
    %120 = vector.broadcast %119 : vector<8x1xf32> to vector<8x8xf32>
    %121 = arith.mulf %110, %120 : vector<8x8xf32>
    %122 = vector.broadcast %1 : f32 to vector<8x8xf32>
    %123 = arith.cmpf olt, %121, %122 : vector<8x8xf32>
    %cst_40 = arith.constant 0.000000e+00 : f32
    %124 = vector.broadcast %cst_40 : f32 to vector<8x8xf32>
    %125 = arith.select %123, %124, %121 : vector<8x8xi1>, vector<8x8xf32>
    %cst_41 = arith.constant dense<0.000000e+00> : vector<8x8xf32>
    %126 = tpu.matmul %125, %102, %cst_41 {dimension_numbers = #tpu.dot_dimension_numbers<[1], [0], [0], [1], [0, 0, 1, 1], [], []>} : vector<8x8xf32>, vector<8x8xf32>, vector<8x8xf32> -> vector<8x8xf32>
    %127 = tpu.concatenate %45, %72, %99, %126 in 1 : vector<8x8xf32>, vector<8x8xf32>, vector<8x8xf32>, vector<8x8xf32> -> vector<8x32xf32>
    %c0_42 = arith.constant 0 : index
    %c0_43 = arith.constant 0 : index
    %c0_44 = arith.constant 0 : index
    %128 = vector.load %arg11[%c0_42, %c0_43, %c0_44] : memref<1x8x32xf32, #tpu.memory_space<vmem>>, vector<1x8x32xf32>
    %129 = vector.shape_cast %128 : vector<1x8x32xf32> to vector<8x32xf32>
    %130 = vector.shape_cast %127 : vector<8x32xf32> to vector<1x8x32xf32>
    tpu.vector_store %arg11[%c0_42, %c0_43, %c0_44], %130 {strides = array<i32>} : memref<1x8x32xf32, #tpu.memory_space<vmem>>, vector<1x8x32xf32>,
    return
  }
  func.func @transform_0(%arg0: i32, %arg1: i32, %arg2: i32) -> i32 {
    %c0_i32 = arith.constant 0 : i32
    %c0_i32_0 = arith.constant 0 : i32
    return %c0_i32 : i32
  }
  func.func @transform_1(%arg0: i32, %arg1: i32, %arg2: i32) -> (i32, i32, i32) {
    %c0_i32 = arith.constant 0 : i32
    %c0_i32_0 = arith.constant 0 : i32
    return %arg0, %arg2, %c0_i32 : i32, i32, i32
  }
  func.func @transform_2(%arg0: i32, %arg1: i32, %arg2: i32) -> (i32, i32, i32) {
    %c0_i32 = arith.constant 0 : i32
    %c0_i32_0 = arith.constant 0 : i32
    %c0_i32_1 = arith.constant 0 : i32
    return %arg0, %c0_i32, %c0_i32_0 : i32, i32, i32
  }
  func.func @transform_3(%arg0: i32, %arg1: i32, %arg2: i32) -> (i32, i32, i32) {
    %c0_i32 = arith.constant 0 : i32
    %c0_i32_0 = arith.constant 0 : i32
    %c0_i32_1 = arith.constant 0 : i32
    return %arg1, %c0_i32, %c0_i32_0 : i32, i32, i32
  }
  func.func @transform_4(%arg0: i32, %arg1: i32, %arg2: i32) -> (i32, i32, i32) {
    %c0_i32 = arith.constant 0 : i32
    %c0_i32_0 = arith.constant 0 : i32
    %c0_i32_1 = arith.constant 0 : i32
    return %arg1, %c0_i32, %c0_i32_0 : i32, i32, i32
  }
  func.func @transform_5(%arg0: i32, %arg1: i32, %arg2: i32) -> (i32, i32, i32) {
    %c0_i32 = arith.constant 0 : i32
    %c0_i32_0 = arith.constant 0 : i32
    %c0_i32_1 = arith.constant 0 : i32
    return %arg1, %c0_i32, %c0_i32_0 : i32, i32, i32
  }
  func.func @transform_6(%arg0: i32, %arg1: i32, %arg2: i32) -> (i32, i32, i32) {
    %c0_i32 = arith.constant 0 : i32
    %c0_i32_0 = arith.constant 0 : i32
    %c0_i32_1 = arith.constant 0 : i32
    return %arg1, %c0_i32, %c0_i32_0 : i32, i32, i32
  }
  func.func @transform_7(%arg0: i32, %arg1: i32, %arg2: i32) -> (i32, i32, i32, i32) {
    %c0_i32 = arith.constant 0 : i32
    %c0_i32_0 = arith.constant 0 : i32
    %c0_i32_1 = arith.constant 0 : i32
    %c0_i32_2 = arith.constant 0 : i32
    return %arg0, %c0_i32, %c0_i32_0, %c0_i32_1 : i32, i32, i32, i32
  }
  func.func @transform_8(%arg0: i32, %arg1: i32, %arg2: i32) -> (i32, i32, i32) {
    %c0_i32 = arith.constant 0 : i32
    return %arg0, %arg2, %arg1 : i32, i32, i32
  }
}

</mosaic_0001>

<bundles_post_ra>
// kernel: softerbert_self_attention.1
= control target key start
LH: loop header
LB: loop body
LE: loop exit
PB: predicated region body
PF: predicated region fallthrough
CT: control target
= control target key end

     0   :  { %13 = vsyncpa [#allocation6], 0  ;;  %s2156_s0 = inlined_call_operand.vmem [shape: f32[2], index: 0, kind: input, shape index: {}]   ;;  %s2157_s1 = inlined_call_operand.vmem [shape: f32[2,8,32], index: 1, kind: input, shape index: {}, may-alias: {1,2}]   ;;  %s2158_s2 = inlined_call_operand.vmem [shape: f32[2,8,32], index: 2, kind: input, shape index: {}, may-alias: {1,2}]   ;;  %s2159_s3 = inlined_call_operand.vmem [shape: f32[1,32,32], index: 3, kind: input, shape index: {}]   ;;  %s2160_s4 = inlined_call_operand.vmem [shape: f32[1,1,32], index: 4, kind: input, shape index: {}]   ;;  %s2161_s5 = inlined_call_operand.vmem [shape: f32[1,32,64], index: 5, kind: input, shape index: {}]   ;;  %s2162_s6 = inlined_call_operand.vmem [shape: f32[1,1,64], index: 6, kind: input, shape index: {}]   ;;  %s2163_s7 = inlined_call_operand.vmem [shape: f32[2,1,1,8], index: 7, kind: input, shape index: {}]   ;;  %s2164_s8 = inlined_call_operand.hbm [shape: f32[2,8,32], index: 8, kind: output, shape index: {}]  }
   0x1   :  { %14 = vsyncpa [#allocation5], 0 }
   0x2   :  { %16 = vsyncpa [#allocation5 + $0x1], 0  ;;  %s1916_s27 = smov 0   ;;  %s1918_s28 = smov 0  }
   0x3   :  { %s1920_s29 = smov 0   ;;  %s1922_s30 = smov 0  }
   0x4   :  { %s1924_s9 = smov 0   ;;  %s1926_s10 = smov 0  }
   0x5 LB: > { %s1524_s11 = sadd.s32 4294967295, %s1857_s10   ;;  %s1525_s12 = sadd.s32 4294967294, %s1857_s10   ;;  %s1857_s10 = sphi %s1926_s10, %s22_s10   ;;  %s1853_s9 = sphi %s1924_s9, %s2173_s9   ;;  %s1849_s30 = sphi %s1922_s30, %s2172_s30   ;;  %s1845_s29 = sphi %s1920_s29, %s2171_s29   ;;  %s1841_s28 = sphi %s1918_s28, %s2170_s28   ;;  %s1837_s27 = sphi %s1916_s27, %s2169_s27  }
   0x6   : > { %s41_s13 = sadd.s32 1, %s1853_s9  ;;  %s257_s14 = sadd.s32 1, %s1845_s29 }
   0x7   : > { %p43_p0 = scmp.ge.s32.totalorder %s41_s13, 2  ;;  %p267_p1 = scmp.ne.s32.totalorder %s1845_s29, %s1841_s28 }
   0x8   : > { %p268_p2 = scmp.eq.s32.totalorder %s1524_s11, 1  ;;  %p273_p3 = scmp.ne.s32.totalorder %s1841_s28, %s1837_s27 }
   0x9   : > { %s2175_s13 = smov (%p43_p0, %s41_s13), 0  ;;  %p274_p5 = scmp.eq.s32.totalorder %s1525_s12, 1 }
   0xa   : > { %p1956_p4 = por %p268_p2, %p267_p1  ;;  %s250_s16 = ssub.s32 %s1853_s9, %s2175_s13 }
   0xb   : > { %p1526_p6 = scmp.ge.s32.totalorder %s1857_s10, 1  ;;  %p255_p7 = scmp.eq.s32.totalorder %s250_s16, 0 }
   0xc   : > { %p1963_p8 = por %p274_p5, %p273_p3  ;;  %p281_p9 = scmp.lt.s32.totalorder %s1857_s10, 3 }
   0xd   : > { %s1969_s18 = scalar_select %p255_p7, %s1845_s29, %s257_s14  }
   0xe   : > { %p1971_p10 = pnand %p1526_p6, %p281_p9  ;;  %p1975_p11 = scmp.eq.s32.totalorder %s1524_s11, 0 }
   0xf   : > { %s294_s23 = sshll.u32 %s2156_s0, 4  ;;  %s295_s23 = int_to_ptr.vmem [resolvable:$true] %s294_s23 }
  0x10   : > { %p1666_p12 = pneg %p1971_p10  ;;  %s1760_s24 = scalar_lea.vmem %s295_s23, 16 }
  0x11   : > { %p1761_p0 = scmp.ne.s32.totalorder %s295_s23, %s1760_s24  ;;  %p1768_p5 = scmp.lt.s32.totalorder %s295_s23, %s295_s23 }
  0x12   : > { %p1667_p13 = pnand %p1975_p11, %p1666_p12  ;;  %p1769_p6 = scmp.lt.s32.totalorder %s1760_s24, %s1760_s24 }
  0x14   : > { %p1762_p1 = pneg %p1667_p13  ;;  %p1770_p7 = por %p1769_p6, %p1768_p5 }
  0x16   : > { %p1763_p2 = pnand %p1762_p1, %p1761_p0 }
  0x18   : > { %p1764_p3 = pneg %p1763_p2 }
  0x1a   : > { %p1771_p9 = pnand %p1770_p7, %p1764_p3 }
  0x1c   : > { %1774 = shalt.err (!%p1771_p9)
}
  0x1d   : > { %s1859_s25 = smov [#allocation4]   ;;  %358 = sbr.rel (%p1971_p10) target bundleno = 1273 (0x4f9), region = 52 }
  0x1e   : > { %1669 = dma.vmem_to_smem (!%p1667_p13), %s295_s23, 16, %s1859_s25, [#allocation6]  }
  0x24   : > { %1828 = dma.done.wait (%p1975_p11), [#allocation6], 16  }
  0x25   : > { %1830 = vsyncadd (%p1975_p11), [#allocation6], 4294967280 }
  0x26   : > { %364 = sfence }
  0x27   : > { %v455_v0 = vld [vmem:[%s2161_s5] sm:$0xff]  ;;  %v456_v1 = vld [vmem:[%s2161_s5 + $0x8] sm:$0xff]  ;;  %v457_v2 = vld [vmem:[%s2161_s5 + $0x10] sm:$0xff]  ;;  %v1860_v3 = vmov 0.0|0.0   ;;  %vm1861_vm0 = vmmov 0   ;;  %v1862_v6 = vmov 0.0  }
  0x28   : > { %1648 = vmatprep.subr.bf16.mxu0 %v1860_v3  ;;  %v1649_v4 = vpack.c.bf16 %v456_v1, %v455_v0  ;;  %v458_v5 = vld [vmem:[%s2161_s5 + $0x18] sm:$0xff]  ;;  %1594 = vmatprep.mubr.msk.f32.mxu0 %vm1861_vm0, %v1862_v6  ;;  %p418_p10 = scmp.lt.s32.totalorder %s1849_s30, 1  ;;  %v547_v7 = vld [vmem:[%s2159_s3] sm:$0xff]  ;;  %v548_v8 = vld [vmem:[%s2159_s3 + $0x8] sm:$0xff]  ;;  %vm466_vm1 = vcmask 261120   ;;  %vm641_vm2 = vcmask 64512  }
  0x29   : > { %1654 = vmatprep.subr.bf16.mxu1 %v1860_v3  ;;  %v1655_v9 = vpack.c.bf16 %v548_v8, %v547_v7  ;;  %v549_v10 = vld [vmem:[%s2159_s3 + $0x10] sm:$0xff]  ;;  %v550_v11 = vld [vmem:[%s2159_s3 + $0x18] sm:$0xff]  ;;  %1605 = vmatprep.mubr.msk.f32.mxu1 %vm1861_vm0, %v1862_v6  ;;  %v1652_v12 = vpack.c.bf16 %v458_v5, %v457_v2  ;;  %v1539_v16 = vld [vmem:[%s2162_s6] ss:$0 sm:$0xff]  ;;  %s1864_s19 = smov 120   ;;  %s1865_s20 = smov 104  }
  0x2a   : > { %1650 = vmatpush3.bf16.msra.mxu0 %v1649_v4  ;;  %s2022_s16 = scalar_select %p418_p10, %s1849_s30, 1  ;;  %v1658_v13 = vpack.c.bf16 %v550_v11, %v549_v10  ;;  %v1541_v22 = vld [vmem:[%s2160_s4] ss:$0 sm:$0xff]  ;;  %vm1341_vm7 = vcmask 130048   ;;  %vm1343_vm8 = vcmask 195584  }
  0x2b   : > { %1651 = vmatprep.subr.bf16.mxu0 %v1860_v3  ;;  %1656 = vmatpush3.bf16.msra.mxu1 %v1655_v9  ;;  %s1538_s26 = sld [smem:[#allocation4 + $0x1]]  ;;  %s1867_s11 = smov 8  }
  0x2c   : > { %s1536_s21 = sshll.u32 %s2022_s16, 3  ;;  %1657 = vmatprep.subr.bf16.mxu1 %v1860_v3  ;;  %s447_s24 = scalar_lea.vmem %s2163_s7, %s2022_s16 }
  0x2d   : > { %s428_s22 = scalar_lea.vmem %s2158_s2, %s1536_s21  ;;  %s424_s25 = scalar_lea.vmem %s2157_s1, %s1536_s21  ;;  %v1543_v31 = vld [vmem:[%s447_s24] ss:$0 sm:$0xff] }
  0x2e   : > { %1653 = vmatpush3.bf16.msra.mxu0 %v1652_v12  ;;  %v454_v14 = vld [vmem:[%s428_s22] sm:$0xff]  ;;  %s1863_s21 = smov 112   ;;  %s1866_s16 = smov 96  }
  0x2f   : > { %1659 = vmatpush3.bf16.msra.mxu1 %v1658_v13  ;;  %v546_v15 = vld [vmem:[%s424_s25] sm:$0xff]  ;;  %1608 = vmatprep.subr.mxu0 %v1862_v6  ;;  %s448_s25 = sld [smem:[#allocation4]]  ;;  %s1868_s12 = smov 16  }
  0x30   : > { %1613 = vmatprep.subr.mxu1 %v1862_v6  ;;  %s1869_s14 = smov 24  }
  0x31   : > { %1595 = vmatmul.mubr.msk.f32.vlgmr.msra.gmra.mrb[0].mxu0 %vm466_vm1, %v454_v14 }
  0x32   : > { %1606 = vmatmul.mubr.msk.f32.vlgmr.msra.gmra.mrb[0].mxu1 %vm466_vm1, %v546_v15  ;;  %1610 = vmatprep.mubr.msk.f32.mxu0 %vm1861_vm0, %v1862_v6  ;;  %v735_v15 = vstv %s1538_s26 }
  0x33   : > { %1615 = vmatprep.mubr.msk.f32.mxu1 %vm1861_vm0, %v1862_v6 }
  0x35   : > { %v727_v10 = vstv %s448_s25 }
 0x104   : > { %v536_v17 = vpop.f32.mrb[0].mxu0 }
 0x105   : > { %v537_v18 = vadd.f32 %v1539_v16, %v536_v17  ;;  %v1596_v19 = vpop.f32.mrb[1].mxu0  ;;  %v628_v20 = vpop.f32.mrb[0].mxu1 }
 0x106   : > { %v1607_v21 = vpop.f32.mrb[1].mxu1  ;;  %v629_v24 = vadd.f32 %v1541_v22, %v628_v20 }
 0x107   : > { %540 = vst.msk [vmem:[#allocation2] sm:$0xff] %vm466_vm1, %v537_v18 }
 0x10e   : > { %v632_v23 = vld [vmem:[#allocation2] sm:$0xff] }
 0x10f   : > { %986 = vrot.lane.b32.xlu1 %v632_v23, %s1863_s21  ;;  %813 = vrot.lane.b32.xlu0 %v632_v23, %s1864_s19 }
 0x110   : > { %1609 = vmatpush3.xpose.msk.msra.mxu0 %vm641_vm2, %v632_v23 }
 0x111   : > { %1618 = vmatprep.subr.mxu0 %v1862_v6 }
 0x113   : > { %1611 = vmatmul.mubr.msk.f32.vlgmr.msra.gmra.mrb[2].mxu0 %vm641_vm2, %v629_v24  ;;  %984 = vrot.lane.b32.xlu1 %v629_v24, %s1863_s21 }
 0x114   : > { %811 = vrot.lane.b32.xlu0 %v629_v24, %s1864_s19  ;;  %1620 = vmatprep.mubr.msk.f32.mxu0 %vm1861_vm0, %v1862_v6 }
 0x117   : > { %1156 = vrot.lane.b32.xlu1 %v629_v24, %s1865_s20 }
 0x118   : > { %1158 = vrot.lane.b32.xlu0 %v632_v23, %s1865_s20 }
 0x181   : > { %v814_v25 = vpop.permute.xlu0 %813  ;;  %v987_v26 = vpop.permute.xlu1 %986 }
 0x182   : > { %1619 = vmatpush3.xpose.msk.msra.mxu0 %vm641_vm2, %v814_v25 }
 0x183   : > { %1628 = vmatprep.subr.mxu0 %v1862_v6 }
 0x185   : > { %v985_v28 = vpop.permute.xlu1 %984 }
 0x186   : > { %v812_v27 = vpop.permute.xlu0 %811 }
 0x187   : > { %1621 = vmatmul.mubr.msk.f32.vlgmr.msra.gmra.mrb[4].mxu0 %vm641_vm2, %v812_v27 }
 0x188   : > { %1629 = vmatpush3.xpose.msk.msra.mxu0 %vm641_vm2, %v987_v26  ;;  %1630 = vmatprep.mubr.msk.f32.mxu0 %vm1861_vm0, %v1862_v6 }
 0x189   : > { %1638 = vmatprep.subr.mxu0 %v1862_v6  ;;  %v1157_v30 = vpop.permute.xlu1 %1156 }
 0x18a   : > { %v1159_v29 = vpop.permute.xlu0 %1158 }
 0x18b   : > { %1631 = vmatmul.mubr.msk.f32.vlgmr.msra.gmra.mrb[6].mxu0 %vm641_vm2, %v985_v28 }
 0x18c   : > { %1639 = vmatpush3.xpose.msk.msra.mxu0 %vm641_vm2, %v1159_v29  ;;  %1640 = vmatprep.mubr.msk.f32.mxu0 %vm1861_vm0, %v1862_v6 }
 0x18f   : > { %1641 = vmatmul.mubr.msk.f32.vlgmr.msra.gmra.mrb[8].mxu0 %vm641_vm2, %v1157_v30 }
 0x1e6   : > { %v714_v32 = vpop.f32.mrb[2].mxu0 }
 0x1e7   : > { %v715_v33 = vadd.f32 %v1543_v31, %v714_v32  ;;  %v1612_v34 = vpop.f32.mrb[3].mxu0 }
 0x1e9   : > { %v718_v35 = vsel %vm641_vm2, %v715_v33, -inf }
 0x1ea   : > { %719 = vmax.xlane.f32.xlu0 %v718_v35 }
 0x25a   : > { %v885_v36 = vpop.f32.mrb[4].mxu0 }
 0x25b   : > { %v886_v37 = vadd.f32 %v1543_v31, %v885_v36  ;;  %v1622_v38 = vpop.f32.mrb[5].mxu0 }
 0x25d   : > { %v889_v39 = vsel %vm641_vm2, %v886_v37, -inf }
 0x25e   : > { %890 = vmax.xlane.f32.xlu1 %v889_v39  ;;  %v1058_v40 = vpop.f32.mrb[6].mxu0 }
 0x25f   : > { %v1059_v41 = vadd.f32 %v1543_v31, %v1058_v40  ;;  %v1632_v42 = vpop.f32.mrb[7].mxu0 }
 0x261   : > { %v1062_v43 = vsel %vm641_vm2, %v1059_v41, -inf }
 0x262   : > { %1063 = vmax.xlane.f32.xlu0 %v1062_v43  ;;  %v1230_v44 = vpop.f32.mrb[8].mxu0 }
 0x263   : > { %v1231_v45 = vadd.f32 %v1543_v31, %v1230_v44  ;;  %v1642_v46 = vpop.f32.mrb[9].mxu0 }
 0x265   : > { %v1234_v47 = vsel %vm641_vm2, %v1231_v45, -inf }
 0x266   : > { %1235 = vmax.xlane.f32.xlu0 %v1234_v47 }
 0x26f   : > { %542 = vrot.lane.b32.xlu1 %v537_v18, %s1866_s16 }
 0x277   : > { %v720_v48 = vpop.xlane.xlu0 %719 }
 0x278   : > { %v721_v49 = vsub.f32 %v715_v33, %v720_v48  ;;  %v724_v3 = vsub.f32 0.0, %v720_v48 }
 0x27a   : > { %v722_v50 = vmul.f32 1.442695, %v721_v49  ;;  %v725_v7 = vmul.f32 1.442695, %v724_v3 }
 0x27c   : > { %1736 = vpow2.f32 %v722_v50 }
 0x286   : > { %v1737_v51 = vpop.eup %1736 }
 0x287   : > { %v729_v52 = vsel %vm641_vm2, %v1737_v51, 0.0 }
 0x288   : > { %730 = vadd.xlane.f32.xlu0 %v729_v52 }
 0x2eb   : > { %v891_v53 = vpop.xlane.xlu1 %890 }
 0x2ec   : > { %v892_v54 = vsub.f32 %v886_v37, %v891_v53  ;;  %v895_v19 = vsub.f32 0.0, %v891_v53 }
 0x2ee   : > { %v893_v55 = vmul.f32 1.442695, %v892_v54  ;;  %v896_v20 = vmul.f32 1.442695, %v895_v19 }
 0x2ef   : > { %v543_v56 = vpop.permute.xlu1 %542  ;;  %v1064_v57 = vpop.xlane.xlu0 %1063 }
 0x2f0   : > { %1738 = vpow2.f32 %v893_v55  ;;  %545 = vst.msk [vmem:[#allocation3] sm:$0xff] %vm466_vm1, %v543_v56  ;;  %v1065_v58 = vsub.f32 %v1059_v41, %v1064_v57  ;;  %v1068_v21 = vsub.f32 0.0, %v1064_v57 }
 0x2f2   : > { %v1066_v59 = vmul.f32 1.442695, %v1065_v58  ;;  %v1069_v22 = vmul.f32 1.442695, %v1068_v21 }
 0x2f3   : > { %v1236_v60 = vpop.xlane.xlu0 %1235 }
 0x2f4   : > { %1740 = vpow2.f32 %v1066_v59  ;;  %v1237_v61 = vsub.f32 %v1231_v45, %v1236_v60  ;;  %v1240_v23 = vsub.f32 0.0, %v1236_v60 }
 0x2f6   : > { %v1238_v62 = vmul.f32 1.442695, %v1237_v61  ;;  %v1241_v24 = vmul.f32 1.442695, %v1240_v23 }
 0x2f7   : > { %v633_v63 = vld [vmem:[#allocation3] sm:$0xff] }
 0x2f8   : > { %1742 = vpow2.f32 %v1238_v62  ;;  %908 = vrot.lane.b32.xlu1 %v633_v63, %s1864_s19  ;;  %1614 = vmatpush3.msra.mxu1 %v633_v63 }
 0x2f9   : > { %1623 = vmatprep.subr.mxu1 %v1862_v6  ;;  %1744 = vpow2.f32 %v725_v7 }
 0x2fa   : > { %v1739_v0 = vpop.eup %1738 }
 0x2fb   : > { %v899_v1 = vsel %vm641_vm2, %v1739_v0, 0.0 }
 0x2fc   : > { %1252 = vrot.lane.b32.xlu1 %v633_v63, %s1865_s20  ;;  %900 = vadd.xlane.f32.xlu0 %v899_v1  ;;  %s1557_s20 = sshll.u32 %s1849_s30, 7 }
 0x2fd   : > { %s2108_s25 = scalar_lea.hbm %s2164_s8, %s1557_s20 }
 0x2fe   : > { %v1741_v2 = vpop.eup %1740 }
 0x2ff   : > { %v1072_v4 = vsel %vm641_vm2, %v1741_v2, 0.0 }
 0x300   : > { %1073 = vadd.xlane.f32.xlu0 %v1072_v4 }
 0x302   : > { %v2084_v5 = vpop.eup %1742 }
 0x303   : > { %v1244_v8 = vsel %vm641_vm2, %v2084_v5, 0.0  ;;  %v1745_v9 = vpop.eup %1744 }
 0x304   : > { %1245 = vadd.xlane.f32.xlu0 %v1244_v8  ;;  %v728_v11 = vmul.f32 %v1745_v9, %v727_v10 }
 0x315   : > { %v731_v12 = vpop.xlane.xlu0 %730 }
 0x316   : > { %v732_v13 = vadd.f32 %v731_v12, %v728_v11 }
 0x318   : > { %1746 = vrcp.f32 %v732_v13 }
 0x319   : > { %1748 = vpow2.f32 %v896_v20 }
 0x31a   : > { %1080 = vrot.lane.b32.xlu0 %v633_v63, %s1863_s21  ;;  %1750 = vpow2.f32 %v1069_v22  ;;  %s415_s21 = sand.u32 1, %s1841_s28  }
 0x31b   : > { %1752 = vpow2.f32 %v1241_v24  ;;  %s1535_s19 = sshll.u32 %s415_s21, 3  ;;  %s1347_s30 = scalar_lea.sflag [#allocation5], %s415_s21 }
 0x31c   : > { %s417_s22 = scalar_lea.vmem [#allocation7], %s1535_s19 }
 0x31d   : > { %s1362_s23 = sshll.u32 %s417_s22, 4  ;;  %s2110_s23 = int_to_ptr.vmem [resolvable:$true] %s1362_s23 }
 0x31e   : > { %s1775_s26 = scalar_lea.vmem %s2110_s23, 128 }
 0x31f   : > { %p1776_p11 = scmp.ne.s32.totalorder %s2110_s23, %s1775_s26 }
 0x321   : > { %p1777_p12 = pnand %p1776_p11, %p1956_p4 }
 0x322   : > { %v1747_v14 = vpop.eup %1746 }
 0x323   : > { %v734_v16 = vmul.f32 %v1747_v14, %v1737_v51  ;;  %v1749_v25 = vpop.eup %1748  ;;  %p1778_p13 = pneg %p1777_p12 }
 0x324   : > { %v898_v26 = vmul.f32 %v1749_v25, %v727_v10  ;;  %v1751_v27 = vpop.eup %1750 }
 0x325   : > { %vm736_vm3 = vcmp.lt.f32.partialorder %v734_v16, %v735_v15  ;;  %v1071_v30 = vmul.f32 %v1751_v27, %v727_v10  ;;  %v1753_v31 = vpop.eup %1752 }
 0x326   : > { %v737_v17 = vsel %vm736_vm3, 0.0, %v734_v16  ;;  %v1243_v34 = vmul.f32 %v1753_v31, %v727_v10 }
 0x327   : > { %1616 = vmatmul.mubr.msk.f32.vlgmr.msra.gmra.mrb[2].mxu1 %vm641_vm2, %v737_v17 }
 0x328   : > { %1625 = vmatprep.mubr.msk.f32.mxu1 %vm1861_vm0, %v1862_v6 }
 0x36a   : > { %v909_v18 = vpop.permute.xlu1 %908 }
 0x36b   : > { %1624 = vmatpush3.msra.mxu1 %v909_v18 }
 0x36c   : > { %1633 = vmatprep.subr.mxu1 %v1862_v6 }
 0x36e   : > { %v1253_v45 = vpop.permute.xlu1 %1252 }
 0x389   : > { %v901_v28 = vpop.xlane.xlu0 %900 }
 0x38a   : > { %v902_v29 = vadd.f32 %v901_v28, %v898_v26 }
 0x38c   : > { %1754 = vrcp.f32 %v902_v29 }
 0x38d   : > { %v1074_v32 = vpop.xlane.xlu0 %1073 }
 0x38e   : > { %v1075_v33 = vadd.f32 %v1074_v32, %v1071_v30 }
 0x390   : > { %1756 = vrcp.f32 %v1075_v33 }
 0x391   : > { %v1246_v35 = vpop.xlane.xlu0 %1245 }
 0x392   : > { %v1247_v36 = vadd.f32 %v1246_v35, %v1243_v34 }
 0x394   : > { %1758 = vrcp.f32 %v1247_v36 }
 0x395   : > { %v1081_v41 = vpop.permute.xlu0 %1080 }
 0x396   : > { %v1755_v37 = vpop.eup %1754 }
 0x397   : > { %v904_v38 = vmul.f32 %v1755_v37, %v1739_v0 }
 0x399   : > { %vm905_vm4 = vcmp.lt.f32.partialorder %v904_v38, %v735_v15 }
 0x39a   : > { %v1757_v39 = vpop.eup %1756  ;;  %v906_v40 = vsel %vm905_vm4, 0.0, %v904_v38 }
 0x39b   : > { %1626 = vmatmul.mubr.msk.f32.vlgmr.msra.gmra.mrb[4].mxu1 %vm641_vm2, %v906_v40  ;;  %v1077_v42 = vmul.f32 %v1757_v39, %v1741_v2 }
 0x39c   : > { %1634 = vmatpush3.msra.mxu1 %v1081_v41  ;;  %1635 = vmatprep.mubr.msk.f32.mxu1 %vm1861_vm0, %v1862_v6 }
 0x39d   : > { %1643 = vmatprep.subr.mxu1 %v1862_v6  ;;  %vm1078_vm5 = vcmp.lt.f32.partialorder %v1077_v42, %v735_v15 }
 0x39e   : > { %v1759_v43 = vpop.eup %1758  ;;  %v1079_v44 = vsel %vm1078_vm5, 0.0, %v1077_v42 }
 0x39f   : > { %1636 = vmatmul.mubr.msk.f32.vlgmr.msra.gmra.mrb[6].mxu1 %vm641_vm2, %v1079_v44  ;;  %v1249_v46 = vmul.f32 %v1759_v43, %v2084_v5 }
 0x3a0   : > { %1644 = vmatpush3.msra.mxu1 %v1253_v45  ;;  %1645 = vmatprep.mubr.msk.f32.mxu1 %vm1861_vm0, %v1862_v6 }
 0x3a1   : > { %vm1250_vm6 = vcmp.lt.f32.partialorder %v1249_v46, %v735_v15 }
 0x3a2   : > { %v1251_v47 = vsel %vm1250_vm6, 0.0, %v1249_v46 }
 0x3a3   : > { %1646 = vmatmul.mubr.msk.f32.vlgmr.msra.gmra.mrb[8].mxu1 %vm641_vm2, %v1251_v47 }
 0x3fa   : > { %v807_v48 = vpop.f32.mrb[2].mxu1 }
 0x3fb   : > { %v1617_v49 = vpop.f32.mrb[3].mxu1 }
 0x46e   : > { %v980_v50 = vpop.f32.mrb[4].mxu1 }
 0x46f   : > { %1329 = vrot.lane.b32.xlu1 %v980_v50, %s1867_s11  ;;  %v1627_v51 = vpop.f32.mrb[5].mxu1  ;;  %s1870_s11 = smov [#allocation7]  }
 0x472   : > { %v1152_v52 = vpop.f32.mrb[6].mxu1 }
 0x473   : > { %1333 = vrot.lane.b32.xlu1 %v1152_v52, %s1868_s12  ;;  %v1637_v53 = vpop.f32.mrb[7].mxu1  ;;  %s1779_s12 = sshll.u32 %s1870_s11, 4  ;;  %s1780_s12 = int_to_ptr.vmem [resolvable:$false] %s1779_s12 }
 0x474   : > { %p1782_p0 = scmp.lt.s32.totalorder %s2110_s23, %s1780_s12 }
 0x476   : > { %v1324_v54 = vpop.f32.mrb[8].mxu1 }
 0x477   : > { %1337 = vrot.lane.b32.xlu1 %v1324_v54, %s1869_s14  ;;  %v1647_v6 = vpop.f32.mrb[9].mxu1  ;;  %s1781_s14 = scalar_lea.vmem %s1780_s12, 256 }
 0x478   : > { %p1783_p1 = scmp.lt.s32.totalorder %s1781_s14, %s1775_s26 }
 0x47a   : > { %p1784_p2 = por %p1783_p1, %p1782_p0 }
 0x47c   : > { %p1785_p3 = pnand %p1784_p2, %p1778_p13 }
 0x4e1   : > { %v1330_v55 = vpop.permute.xlu1 %1329 }
 0x4e2   : > { %v1340_v57 = vsel %vm641_vm2, %v807_v48, %v1330_v55 }
 0x4e5   : > { %v1334_v56 = vpop.permute.xlu1 %1333 }
 0x4e6   : > { %v1342_v58 = vsel %vm1341_vm7, %v1340_v57, %v1334_v56 }
 0x4e9   : > { %v1338_v59 = vpop.permute.xlu1 %1337 }
 0x4ea   : > { %v1344_v60 = vsel %vm1343_vm8, %v1342_v58, %v1338_v59 }
 0x4eb   : > { %1345 = vst.msk [vmem:[%s417_s22] sm:$0xff] %vm466_vm1, %v1344_v60 }
 0x4ec   : > { %1788 = shalt.err (!%p1785_p3)
}
 0x4ed   : > { %s1789_s21 = scalar_lea.hbm %s2108_s25, 128  ;;  %s1793_s22 = scalar_lea.hbm %s2164_s8, 256 }
 0x4ee   : > { %p1790_p5 = scmp.ne.s32.totalorder %s2108_s25, %s1789_s21  ;;  %p1794_p9 = scmp.lt.u32.totalorder %s2108_s25, %s2164_s8 }
 0x4ef   : > { %p1795_p10 = scmp.lt.u32.totalorder %s1793_s22, %s1789_s21  ;;  %p1797_p12 = scmp.lt.u32.totalorder %s1789_s21, %s2108_s25 }
 0x4f0   : > { %p1791_p6 = pnand %p1790_p5, %p1956_p4 }
 0x4f1   : > { %p1796_p11 = por %p1795_p10, %p1794_p9 }
 0x4f2   : > { %p1792_p7 = pneg %p1791_p6 }
 0x4f3   : > { %p1798_p13 = por %p1797_p12, %p1796_p11 }
 0x4f5   : > { %p1799_p0 = pnand %p1798_p13, %p1792_p7 }
 0x4f7   : > { %1802 = shalt.err (!%p1799_p0)
}
 0x4f8   : > { %1664 = dma.vmem_to_hbm [thread:$0]  (%p1956_p4), %s2110_s23, 128, %s2108_s25, %s1347_s30  }
 0x4f9 PF: > { %p1676_p1 = scmp.ge.s32.totalorder %s1857_s10, 2  ;;  %s1374_s26 = sand.u32 1, %s1837_s27  }
 0x4fa   : > { %s1375_s11 = scalar_lea.sflag [#allocation5], %s1374_s26 }
 0x4fb   : > { %p1671_p2 = pnand %p1676_p1, %p1963_p8 }
 0x4fd   : > { %1832 = dma.done.wait (!%p1671_p2), %s1375_s11, 128  }
 0x4fe   : > { %1834 = vsyncadd (!%p1671_p2), %s1375_s11, 4294967168  ;;  %s22_s10 = sadd.s32 1, %s1857_s10   ;;  %s2169_s27 = smov %s1841_s28 }
 0x4ff   : > { %p19_p3 = scmp.ge.s32.totalorder %s22_s10, 4   ;;  %s2170_s28 = smov %s1845_s29 }
 0x500   : > { %s2171_s29 = smov %s1969_s18  ;;  %s2172_s30 = smov %s1853_s9 }
 0x501   : > { %s2173_s9 = smov %s2175_s13  ;;  %21 = sbr.rel (!%p19_p3) target bundleno = 5 (0x5), region = 114 }
 0x508   :  { %1380 = vsyncpa [#allocation5], 1 }
 0x509   :  { %1382 = vsyncpa [#allocation5 + $0x1], 1 }
 0x50a   :  { %1383 = vsyncpa [#allocation6], 1 }
 0x50b   :  { %1385 = vsyncpa [#allocation6 + $0x1], 1 }

</bundles_post_ra>
